<compile_context>
chip_gen: v7x
topology: tpu7x:2x2x1
jax: 0.10.0
libtpu: 0.0.40
codegen_flags: <defaults>
</compile_context>

<pallas_src>
import functools

import jax
import jax.numpy as jnp
from jax import lax
from jax.experimental import pallas as pl
from jax.experimental.pallas import tpu as pltpu


# ---------------------------------------------------------------------------
# Static MultiLoss configuration (mirrors __init__ / append semantics).
# ---------------------------------------------------------------------------
LOSS_TYPES = ("mse", "l1")          # losslist
APPLYTO_PRED = [2, 2]               # channels per loss (prediction)
APPLYTO_TARGET = [2, 2]             # channels per loss (target)
WEIGHTS = [1.0, 0.5]


def _make_slices(applyto):
    # Reproduces:  lst = [0] + applyto
    #   start_i = lst[i];  stop_i = lst[i] + lst[i + 1]
    lst = [0] + list(applyto)
    return [(lst[i], lst[i] + lst[i + 1]) for i in range(len(applyto))]


PRED_SLICES = _make_slices(APPLYTO_PRED)
TARG_SLICES = _make_slices(APPLYTO_TARGET)
NUM_LOSSES = len(LOSS_TYPES)

# Fused single-accumulator fast path assumptions (hold for this config):
assert PRED_SLICES == TARG_SLICES, "fast path needs matching pred/target slices"
assert LOSS_TYPES == ("mse", "l1"), "fused accumulator assumes [MSE, L1] order"
assert PRED_SLICES[0][1] == PRED_SLICES[1][0], "loss ranges must be contiguous"


# ---------------------------------------------------------------------------
# Kernel: grid (N, col_tiles).  Batch axis is "parallel" (v7x megacore); the
# fused accumulator is (re)initialised at j==0 for every batch index and the
# per-batch weighted partial loss is written to its own output block at the
# last column tile.  Column axis is the sequential reduction axis.
# ---------------------------------------------------------------------------
def multiloss_kernel(pred_ref, targ_ref, out_ref, acc_ref, *,
                     fold, hw_folded, tile_cols, needs_mask,
                     mse_row_end, n_elems_per_chan):
    j = pl.program_id(1)
    last_j = pl.num_programs(1) - 1

    @pl.when(j == 0)
    def _init():
        acc_ref[...] = jnp.zeros_like(acc_ref)

    pred = pred_ref[...].astype(jnp.float32)     # (C*fold, tile_cols)
    targ = targ_ref[...].astype(jnp.float32)
    # TODO(synk): for bf16 inputs a bf16 subtract + single f32 upcast would
    # shave one cast/elem on v6e/v7x at the cost of tiny numerics drift.
    d = pred - targ

    def _accumulate(dd):
        # Single fused accumulator: MSE rows hold sum(d^2), L1 rows sum(|d|).
        row = lax.broadcasted_iota(jnp.int32, dd.shape, 0)
        contrib = jnp.where(row < mse_row_end, dd * dd, jnp.abs(dd))
        acc_ref[...] = acc_ref[...] + contrib

    if needs_mask:
        # Pay the lane mask only on the last (ragged) column tile.
        @pl.when(j != last_j)
        def _full_tile():
            _accumulate(d)

        @pl.when(j == last_j)
        def _tail_tile():
            lane = lax.broadcasted_iota(jnp.int32, d.shape, 1)
            valid = (j * tile_cols + lane) < hw_folded
            # Mask BEFORE squaring/abs so padded garbage never contributes.
            _accumulate(jnp.where(valid, d, 0.0))
    else:
        _accumulate(d)

    @pl.when(j == last_j)
    def _finalize():
        partial = jnp.float32(0.0)
        for i in range(NUM_LOSSES):
            sp, ep = PRED_SLICES[i]
            rs, re = sp * fold, ep * fold          # channel range -> folded rows
            s = jnp.sum(acc_ref[rs:re, :])         # one-time XLU reduce
            count = jnp.float32((ep - sp) * n_elems_per_chan)   # mean reduction
            partial = partial + jnp.float32(WEIGHTS[i]) * (s / count)
        out_ref[...] = jnp.full(out_ref.shape, partial, dtype=jnp.float32)


def multiloss(prediction, target, tile_cols=None):
    """prediction/target: NCHW arrays (any float dtype). Returns scalar loss."""
    N, C, H, W = prediction.shape
    assert target.shape == (N, C, H, W)
    hw = H * W
    itemsize = jnp.dtype(prediction.dtype).itemsize

    # Dtype-aware sublane fold: fill the native packed vreg rows
    # (f32 -> 8, bf16 -> 16, int8/fp8 -> 32).
    target_rows = {4: 8, 2: 16, 1: 32}.get(itemsize, 8)
    fold = 1
    while C * fold * 2 <= target_rows and hw % (fold * 2) == 0:
        fold *= 2
    cf = C * fold
    hwf = hw // fold

    # Free, contiguous reshape (no transpose): NCHW -> (N, C*fold, HW/fold).
    pred3 = prediction.reshape(N, cf, hwf)
    targ3 = target.reshape(N, cf, hwf)

    # ~2 MiB per input block. Budget per core:
    #   2 inputs x 2 buffers x 2 MiB + f32 accumulator (<= 4 MiB) ~= 12 MiB,
    # comfortably inside v7x's 32 MiB scoped / 64 MiB physical VMEM per TC.
    if tile_cols is None:
        cap = max(128, ((2 << 20) // (cf * itemsize)) // 128 * 128)
        cap = min(cap, pl.cdiv(hwf, 128) * 128)
        tile_cols = cap
        if hwf % tile_cols != 0:
            # Prefer an evenly-dividing tile (no mask at all), as long as it
            # stays within 2x of the target block size.
            t = (tile_cols // 128) * 128
            while t >= 128 and 2 * t >= cap:
                if hwf % t == 0:
                    tile_cols = t
                    break
                t -= 128
    n_tiles = pl.cdiv(hwf, tile_cols)
    needs_mask = (hwf % tile_cols) != 0

    mse_row_end = PRED_SLICES[0][1] * fold   # rows [0, mse_row_end) are MSE

    kern = functools.partial(
        multiloss_kernel,
        fold=fold, hw_folded=hwf, tile_cols=tile_cols,
        needs_mask=needs_mask, mse_row_end=mse_row_end,
        n_elems_per_chan=N * hw)

    partials = pl.pallas_call(
        kern,
        out_shape=jax.ShapeDtypeStruct((N, 8, 128), jnp.float32),
        grid_spec=pltpu.PrefetchScalarGridSpec(
            num_scalar_prefetch=0,
            grid=(N, n_tiles),
            in_specs=[
                pl.BlockSpec((None, cf, tile_cols), lambda n, j: (n, 0, j)),
                pl.BlockSpec((None, cf, tile_cols), lambda n, j: (n, 0, j)),
            ],
            # Per-batch, lane-dense partial output block (disjoint per core).
            out_specs=pl.BlockSpec((None, 8, 128), lambda n, j: (n, 0, 0)),
            scratch_shapes=[
                pltpu.VMEM((cf, tile_cols), jnp.float32),   # fused accumulator
            ],
        ),
        # Batch axis split across TensorCores on v7x; column axis is the
        # sequential reduction carrying the accumulator.
        compiler_params=pltpu.CompilerParams(
            dimension_semantics=("parallel", "arbitrary"),
            vmem_limit_bytes=32 * 1024 * 1024),
    )(pred3, targ3)

    # Tiny JAX epilogue: per-batch weighted partials (already divided by the
    # global per-loss counts) sum to the final loss; this is also the
    # cross-TensorCore combine on v7x.
    return jnp.sum(partials[:, 0, 0])


# ---------------------------------------------------------------------------
# Pure-JAX reference (mirrors the PyTorch forward exactly).
# ---------------------------------------------------------------------------
def multiloss_ref(prediction, target):
    cum = jnp.float32(0.0)
    for i in range(NUM_LOSSES):
        sp, ep = PRED_SLICES[i]
        st, et = TARG_SLICES[i]
        p = prediction[:, sp:ep].astype(jnp.float32)
        t = target[:, st:et].astype(jnp.float32)
        d = p - t
        if LOSS_TYPES[i] == "mse":
            val = jnp.mean(d * d)
        else:
            val = jnp.mean(jnp.abs(d))
        cum = cum + jnp.float32(WEIGHTS[i]) * val
    return cum


if __name__ == "__main__":
    key = jax.random.PRNGKey(0)
    k1, k2 = jax.random.split(key)
    N, C, H, W = 2, 4, 16, 16
    prediction = jax.random.normal(k1, (N, C, H, W), dtype=jnp.float32)
    target = jax.random.normal(k2, (N, C, H, W), dtype=jnp.float32)

    out = multiloss(prediction, target)
    out = jax.block_until_ready(out)

    ref = multiloss_ref(prediction, target)
    assert jnp.allclose(out, ref, rtol=1e-5, atol=1e-5), (out, ref)

    print("KERNEL_OK")
</pallas_src>

<mosaic_0001>
module attributes {stable_mosaic.version = 11 : i64} {
  func.func @multiloss_kernel(%arg0: i32, %arg1: i32, %arg2: memref<1x8x128xf32, #tpu.memory_space<vmem>>, %arg3: memref<1x8x128xf32, #tpu.memory_space<vmem>>, %arg4: memref<1x8x128xf32, #tpu.memory_space<vmem>>, %arg5: memref<8x128xf32, #tpu.memory_space<vmem>>) attributes {dimension_semantics = [#tpu.dimension_semantics<parallel>, #tpu.dimension_semantics<arbitrary>], iteration_bounds = array<i64: 2, 1>, scalar_prefetch = 0 : i64, scratch_operands = 1 : i64, tpu.core_type = #tpu.core_type<tc>, window_params = [{transform_indices = @transform_0, window_bounds = array<i64: 1, 8, 128>}, {transform_indices = @transform_1, window_bounds = array<i64: 1, 8, 128>}, {transform_indices = @transform_2, window_bounds = array<i64: 1, 8, 128>}]} {
    %c0_i32 = arith.constant 0 : i32
    %0 = arith.cmpi eq, %arg1, %c0_i32 : i32
    %1 = arith.extui %0 : i1 to i32
    %c0_i32_0 = arith.constant 0 : i32
    %2 = arith.cmpi ne, %1, %c0_i32_0 : i32
    scf.if %2 {
      %cst = arith.constant 0.000000e+00 : f32
      %20 = vector.broadcast %cst : f32 to vector<8x128xf32>
      %c0_12 = arith.constant 0 : index
      %c0_13 = arith.constant 0 : index
      %21 = vector.load %arg5[%c0_12, %c0_13] : memref<8x128xf32, #tpu.memory_space<vmem>>, vector<8x128xf32>
      tpu.vector_store %arg5[%c0_12, %c0_13], %20 {strides = array<i32>} : memref<8x128xf32, #tpu.memory_space<vmem>>, vector<8x128xf32>,
    } else {
    }
    %c0 = arith.constant 0 : index
    %c0_1 = arith.constant 0 : index
    %c0_2 = arith.constant 0 : index
    %3 = vector.load %arg2[%c0, %c0_1, %c0_2] : memref<1x8x128xf32, #tpu.memory_space<vmem>>, vector<1x8x128xf32>
    %4 = vector.shape_cast %3 : vector<1x8x128xf32> to vector<8x128xf32>
    %c0_3 = arith.constant 0 : index
    %c0_4 = arith.constant 0 : index
    %c0_5 = arith.constant 0 : index
    %5 = vector.load %arg3[%c0_3, %c0_4, %c0_5] : memref<1x8x128xf32, #tpu.memory_space<vmem>>, vector<1x8x128xf32>
    %6 = vector.shape_cast %5 : vector<1x8x128xf32> to vector<8x128xf32>
    %7 = arith.subf %4, %6 : vector<8x128xf32>
    %8 = tpu.iota {dimensions = array<i32: 0>} : vector<8x128xi32>
    %c4_i32 = arith.constant 4 : i32
    %9 = vector.broadcast %c4_i32 : i32 to vector<8x128xi32>
    %10 = arith.cmpi slt, %8, %9 : vector<8x128xi32>
    %11 = arith.mulf %7, %7 : vector<8x128xf32>
    %12 = math.absf %7 : vector<8x128xf32>
    %13 = arith.select %10, %11, %12 : vector<8x128xi1>, vector<8x128xf32>
    %c0_6 = arith.constant 0 : index
    %c0_7 = arith.constant 0 : index
    %14 = vector.load %arg5[%c0_6, %c0_7] : memref<8x128xf32, #tpu.memory_space<vmem>>, vector<8x128xf32>
    %15 = arith.addf %14, %13 : vector<8x128xf32>
    %c0_8 = arith.constant 0 : index
    %c0_9 = arith.constant 0 : index
    %16 = vector.load %arg5[%c0_8, %c0_9] : memref<8x128xf32, #tpu.memory_space<vmem>>, vector<8x128xf32>
    tpu.vector_store %arg5[%c0_8, %c0_9], %15 {strides = array<i32>} : memref<8x128xf32, #tpu.memory_space<vmem>>, vector<8x128xf32>,
    %c0_i32_10 = arith.constant 0 : i32
    %17 = arith.cmpi eq, %arg1, %c0_i32_10 : i32
    %18 = arith.extui %17 : i1 to i32
    %c0_i32_11 = arith.constant 0 : i32
    %19 = arith.cmpi ne, %18, %c0_i32_11 : i32
    scf.if %19 {
      %c0_12 = arith.constant 0 : index
      %c0_13 = arith.constant 0 : index
      %20 = vector.load %arg5[%c0_12, %c0_13] : memref<8x128xf32, #tpu.memory_space<vmem>>, vector<4x128xf32>
      %21 = vector.shape_cast %20 : vector<4x128xf32> to vector<1x4x128xf32>
      %cst = arith.constant dense<0.000000e+00> : vector<1xf32>
      %22 = vector.multi_reduction <add>, %21, %cst [1, 2] : vector<1x4x128xf32> to vector<1xf32>
      %23 = vector.shape_cast %22 : vector<1xf32> to vector<1x1x1xf32>
      %24 = vector.extract %23[0, 0, 0] : f32 from vector<1x1x1xf32>
      %cst_14 = arith.constant 1.024000e+03 : f32
      %25 = arith.divf %24, %cst_14 : f32
      %cst_15 = arith.constant 1.000000e+00 : f32
      %26 = arith.mulf %cst_15, %25 : f32
      %cst_16 = arith.constant 0.000000e+00 : f32
      %27 = arith.addf %cst_16, %26 : f32
      %c4 = arith.constant 4 : index
      %c0_17 = arith.constant 0 : index
      %28 = vector.load %arg5[%c4, %c0_17] : memref<8x128xf32, #tpu.memory_space<vmem>>, vector<4x128xf32>
      %29 = vector.shape_cast %28 : vector<4x128xf32> to vector<1x4x128xf32>
      %cst_18 = arith.constant dense<0.000000e+00> : vector<1xf32>
      %30 = vector.multi_reduction <add>, %29, %cst_18 [1, 2] : vector<1x4x128xf32> to vector<1xf32>
      %31 = vector.shape_cast %30 : vector<1xf32> to vector<1x1x1xf32>
      %32 = vector.extract %31[0, 0, 0] : f32 from vector<1x1x1xf32>
      %cst_19 = arith.constant 1.024000e+03 : f32
      %33 = arith.divf %32, %cst_19 : f32
      %cst_20 = arith.constant 5.000000e-01 : f32
      %34 = arith.mulf %cst_20, %33 : f32
      %35 = arith.addf %27, %34 : f32
      %36 = vector.broadcast %35 : f32 to vector<8x128xf32>
      %c0_21 = arith.constant 0 : index
      %c0_22 = arith.constant 0 : index
      %c0_23 = arith.constant 0 : index
      %37 = vector.load %arg4[%c0_21, %c0_22, %c0_23] : memref<1x8x128xf32, #tpu.memory_space<vmem>>, vector<1x8x128xf32>
      %38 = vector.shape_cast %37 : vector<1x8x128xf32> to vector<8x128xf32>
      %39 = vector.shape_cast %36 : vector<8x128xf32> to vector<1x8x128xf32>
      tpu.vector_store %arg4[%c0_21, %c0_22, %c0_23], %39 {strides = array<i32>} : memref<1x8x128xf32, #tpu.memory_space<vmem>>, vector<1x8x128xf32>,
    } else {
    }
    return
  }
  func.func @transform_0(%arg0: i32, %arg1: i32) -> (i32, i32, i32) {
    %c0_i32 = arith.constant 0 : i32
    %c0_i32_0 = arith.constant 0 : i32
    return %arg0, %c0_i32, %arg1 : i32, i32, i32
  }
  func.func @transform_1(%arg0: i32, %arg1: i32) -> (i32, i32, i32) {
    %c0_i32 = arith.constant 0 : i32
    %c0_i32_0 = arith.constant 0 : i32
    return %arg0, %c0_i32, %arg1 : i32, i32, i32
  }
  func.func @transform_2(%arg0: i32, %arg1: i32) -> (i32, i32, i32) {
    %c0_i32 = arith.constant 0 : i32
    %c0_i32_0 = arith.constant 0 : i32
    %c0_i32_1 = arith.constant 0 : i32
    return %arg0, %c0_i32, %c0_i32_0 : i32, i32, i32
  }
}

</mosaic_0001>

<bundles_post_ra>
// kernel: tpu_custom_call.1
= control target key start
LH: loop header
LB: loop body
LE: loop exit
PB: predicated region body
PF: predicated region fallthrough
CT: control target
= control target key end

     0   :  { %7 = vsyncpa [#allocation4], 0  ;;  %s864_s0 = inlined_call_operand.hbm [shape: f32[2,8,128], index: 0, kind: input, shape index: {}]   ;;  %s865_s1 = inlined_call_operand.hbm [shape: f32[2,8,128], index: 1, kind: input, shape index: {}]   ;;  %s866_s2 = inlined_call_operand.hbm [shape: f32[2,8,128], index: 2, kind: output, shape index: {}]  }
   0x1   :  { %9 = vsyncpa [#allocation4 + $0x1], 0 }
   0x2   :  { %10 = vsyncpa [#allocation7], 0 }
   0x3   :  { %12 = vsyncpa [#allocation7 + $0x1], 0 }
   0x4   :  { %13 = vsyncpa [#allocation5], 0 }
   0x5   :  { %15 = vsyncpa [#allocation5 + $0x1], 0  ;;  %s639_s9 = smov 0   ;;  %s641_s10 = smov 0  }
   0x6   :  { %s643_s11 = smov 0   ;;  %s645_s12 = smov 0  }
   0x7   :  { %s647_s13 = smov 0   ;;  %s649_s14 = smov 0  }
   0x8 LB: > { %s385_s15 = sadd.s32 4294967295, %s619_s14   ;;  %s386_s16 = sadd.s32 4294967294, %s619_s14   ;;  %s619_s14 = sphi %s649_s14, %s21_s14   ;;  %s615_s13 = sphi %s647_s13, %s886_s13   ;;  %s611_s12 = sphi %s645_s12, %s885_s12   ;;  %s607_s11 = sphi %s643_s11, %s884_s11   ;;  %s603_s10 = sphi %s641_s10, %s883_s10   ;;  %s599_s9 = sphi %s639_s9, %s882_s9  }
   0x9   : > { %s33_s17 = sadd.s32 1, %s615_s13  ;;  %s42_s18 = sadd.s32 1, %s607_s11 }
   0xa   : > { %p35_p0 = scmp.ge.s32.totalorder %s33_s17, 2  ;;  %p49_p1 = scmp.ne.s32.totalorder %s607_s11, %s603_s10 }
   0xb   : > { %p50_p2 = scmp.eq.s32.totalorder %s619_s14, 0  ;;  %p55_p3 = scmp.ne.s32.totalorder %s603_s10, %s599_s9 }
   0xc   : > { %s888_s17 = smov (%p35_p0, %s33_s17), 0  ;;  %p56_p5 = scmp.eq.s32.totalorder %s385_s15, 0 }
   0xd   : > { %p680_p4 = por %p50_p2, %p49_p1  ;;  %s37_s20 = ssub.s32 %s615_s13, %s888_s17 }
   0xe   : > { %p107_p6 = scmp.eq.s32.totalorder %s385_s15, 1  ;;  %p40_p7 = scmp.eq.s32.totalorder %s37_s20, 0 }
   0xf   : > { %p686_p8 = por %p56_p5, %p55_p3  ;;  %p113_p10 = scmp.eq.s32.totalorder %s386_s16, 1 }
  0x10   : > { %p690_p9 = por %p107_p6, %p49_p1  ;;  %p422_p13 = scmp.lt.s32.totalorder %s619_s14, 2 }
  0x11   : > { %s870_s21 = scalar_select %p686_p8, 1, 0 }
  0x12   : > { %s871_s22 = scalar_select %p690_p9, 1, 0 }
  0x13   : > { %s695_s23 = scalar_select %p40_p7, %s607_s11, %s42_s18  }
  0x14   : > { %p697_p11 = por %p113_p10, %p55_p3  ;;  %s704_s25 = sand.u32 1, %s607_s11  }
  0x15   : > { %s389_s26 = sshll.u32 %s704_s25, 3  ;;  %s390_s27 = sshll.u32 %s615_s13, 7 }
  0x16   : > { %s872_s24 = scalar_select %p697_p11, 1, 0 }
  0x17   : > { %s713_s30 = scalar_lea.hbm %s864_s0, %s390_s27  ;;  %s137_s3 = scalar_lea.vmem [#allocation3], %s389_s26 }
  0x18   : > { %s145_s4 = sshll.u32 %s137_s3, 4  ;;  %p721_p0 = pnand %p422_p13, %p680_p4  ;;  %s717_s4 = int_to_ptr.vmem [resolvable:$true] %s145_s4 }
  0x19   : > { %s134_s6 = scalar_lea.sflag [#allocation4], %s704_s25  ;;  %s473_s7 = scalar_lea.hbm %s713_s30, 128 }
  0x1a   : > { %p474_p3 = scmp.ne.s32.totalorder %s713_s30, %s473_s7  ;;  %p475_p5 = pneg %p721_p0 }
  0x1b   : > { %s478_s16 = scalar_lea.hbm %s864_s0, 256  ;;  %p479_p4 = scmp.lt.u32.totalorder %s713_s30, %s864_s0 }
  0x1c   : > { %p476_p6 = pnand %p475_p5, %p474_p3  ;;  %p480_p10 = scmp.lt.u32.totalorder %s478_s16, %s473_s7 }
  0x1d   : > { %p482_p12 = scmp.lt.u32.totalorder %s473_s7, %s713_s30 }
  0x1e   : > { %p477_p7 = pneg %p476_p6  ;;  %p481_p13 = por %p480_p10, %p479_p4 }
  0x20   : > { %p483_p1 = por %p482_p12, %p481_p13 }
  0x22   : > { %p484_p2 = pnand %p483_p1, %p477_p7 }
  0x24   : > { %487 = shalt.err (!%p484_p2)
}
  0x25   : > { %s488_s20 = scalar_lea.vmem %s717_s4, 128  ;;  %s621_s28 = smov [#allocation3]  }
  0x26   : > { %p489_p3 = scmp.ne.s32.totalorder %s717_s4, %s488_s20  ;;  %s493_s29 = sshll.u32 %s621_s28, 4  ;;  %s494_s29 = int_to_ptr.vmem [resolvable:$false] %s493_s29 }
  0x27   : > { %s495_s3 = scalar_lea.vmem %s494_s29, 256  ;;  %p496_p9 = scmp.lt.s32.totalorder %s717_s4, %s494_s29 }
  0x28   : > { %p491_p6 = pnand %p489_p3, %p475_p5  ;;  %p497_p4 = scmp.lt.s32.totalorder %s495_s3, %s488_s20 }
  0x2a   : > { %p492_p11 = pneg %p491_p6  ;;  %p498_p10 = por %p497_p4, %p496_p9 }
  0x2c   : > { %p499_p12 = pnand %p498_p10, %p492_p11 }
  0x2e   : > { %502 = shalt.err (!%p499_p12)
}
  0x2f   : > { %414 = dma.hbm_to_vmem [thread:$0]  (!%p721_p0), %s713_s30, 128, %s717_s4, %s134_s6  }
  0x30   : > { %p874_p1 = scmp.lt.s32.totalorder %s619_s14, 3  ;;  %p875_p2 = scmp.ge.s32.totalorder %s619_s14, 1 }
  0x31   : > { %s766_s16 = scalar_lea.hbm %s865_s1, %s390_s27  ;;  %s156_s18 = scalar_lea.vmem [#allocation6], %s389_s26 }
  0x32   : > { %p757_p7 = pnand %p875_p2, %p874_p1  ;;  %s164_s19 = sshll.u32 %s156_s18, 4  ;;  %s165_s19 = int_to_ptr.vmem [resolvable:$true] %s164_s19 }
  0x33   : > { %s153_s30 = scalar_lea.sflag [#allocation7], %s704_s25  ;;  %s503_s4 = scalar_lea.hbm %s766_s16, 128 }
  0x34   : > { %s876_s7 = scalar_select %p757_p7, 1, 0 }
  0x35   : > { %p504_p9 = scmp.ne.s32.totalorder %s766_s16, %s503_s4  ;;  %s508_s27 = scalar_lea.hbm %s865_s1, 256 }
  0x36   : > { %p509_p3 = scmp.lt.u32.totalorder %s766_s16, %s865_s1  ;;  %p510_p6 = scmp.lt.u32.totalorder %s508_s27, %s503_s4 }
  0x37   : > { %p506_p11 = pnand %p504_p9, %p475_p5  ;;  %p512_p10 = scmp.lt.u32.totalorder %s503_s4, %s766_s16 }
  0x38   : > { %p511_p4 = por %p510_p6, %p509_p3 }
  0x39   : > { %p507_p13 = pneg %p506_p11 }
  0x3a   : > { %p513_p12 = por %p512_p10, %p511_p4 }
  0x3c   : > { %p514_p1 = pnand %p513_p12, %p507_p13 }
  0x3e   : > { %517 = shalt.err (!%p514_p1)
}
  0x3f   : > { %s518_s25 = scalar_lea.vmem %s165_s19, 128  ;;  %s622_s26 = smov [#allocation6]  }
  0x40   : > { %p519_p2 = scmp.ne.s32.totalorder %s165_s19, %s518_s25  ;;  %s523_s3 = sshll.u32 %s622_s26, 4  ;;  %s524_s3 = int_to_ptr.vmem [resolvable:$false] %s523_s3 }
  0x41   : > { %s525_s8 = scalar_lea.vmem %s524_s3, 256  ;;  %p526_p8 = scmp.lt.s32.totalorder %s165_s19, %s524_s3 }
  0x42   : > { %p521_p9 = pnand %p519_p2, %p475_p5  ;;  %p527_p7 = scmp.lt.s32.totalorder %s525_s8, %s518_s25 }
  0x44   : > { %p522_p11 = pneg %p521_p9  ;;  %p528_p3 = por %p527_p7, %p526_p8 }
  0x46   : > { %p529_p6 = pnand %p528_p3, %p522_p11 }
  0x48   : > { %532 = shalt.err (!%p529_p6)
}
  0x49   : > { %417 = dma.hbm_to_vmem [thread:$0]  (!%p721_p0), %s766_s16, 128, %s165_s19, %s153_s30  }
  0x4a   : > { %p877_p13 = scmp.ne.s32.totalorder %s876_s7, 0 }
  0x4b   : > { %s793_s15 = sand.u32 (!%p877_p13), 1, %s603_s10   ;;  %p878_p8 = scmp.ne.s32.totalorder (!%p877_p13), %s870_s21, 0 }
  0x4c   : > { %173 = sbr.rel (%p877_p13) target bundleno = 330 (0x14a), region = 28  ;;  %s796_s18 = sshll.u32 (!%p877_p13), %s793_s15, 3 }
  0x4d   : > { %s176_s4 = scalar_lea.sflag (!%p877_p13), [#allocation4], %s793_s15  ;;  %s179_s6 = scalar_lea.vmem (!%p877_p13), [#allocation3], %s796_s18 }
  0x53   : > { %586 = dma.done.wait (%p878_p8), %s176_s4, 128  }
  0x54   : > { %588 = vsyncadd (%p878_p8), %s176_s4, 4294967168  ;;  %s185_s5 = scalar_lea.sflag [#allocation7], %s793_s15  ;;  %s188_s7 = scalar_lea.vmem [#allocation6], %s796_s18 }
  0x55   : > { %590 = dma.done.wait (%p878_p8), %s185_s5, 128  }
  0x56   : > { %592 = vsyncadd (%p878_p8), %s185_s5, 4294967168  ;;  %v222_v0 = vlaneseq  ;;  %v219_v2 = vld [vmem:[%s179_s6] sm:$0xff]  ;;  %v220_v3 = vld [vmem:[%s188_s7] sm:$0xff]  ;;  %vm235_vm1 = vcmask 1043456   ;;  %s398_s20 = sshll.u32 %s611_s12, 7  ;;  %s213_s28 = scalar_lea.vmem [#allocation8], %s796_s18 }
  0x57   : > { %v221_v4 = vsub.f32 %v219_v2, %v220_v3  ;;  %s282_s29 = sshll.u32 %s213_s28, 4  ;;  %s815_s8 = scalar_lea.hbm %s866_s2, %s398_s20  ;;  %s817_s29 = int_to_ptr.vmem [resolvable:$true] %s282_s29 }
  0x58   : > { %v223_v1 = vshrl.u32 %v222_v0, 7  ;;  %s269_s4 = scalar_lea.sflag [#allocation5], %s793_s15  ;;  %s533_s6 = scalar_lea.vmem %s817_s29, 128 }
  0x59   : > { %v225_v5 = vmul.f32 %v221_v4, %v221_v4  ;;  %v226_v6 = vand.u32 2147483647, %v221_v4  ;;  %p534_p0 = scmp.ne.s32.totalorder %s817_s29, %s533_s6  ;;  %p879_p5 = scmp.ne.s32.totalorder %s871_s22, 0 }
  0x5a   : > { %vm224_vm0 = vcmp.lt.s32.totalorder %v223_v1, 4  ;;  %s623_s12 = smov [#allocation8]  }
  0x5b   : > { %v227_v7 = vsel %vm224_vm0, %v225_v5, %v226_v6  ;;  %p535_p7 = pnand %p534_p0, %p879_p5  ;;  %s537_s18 = sshll.u32 %s623_s12, 4  ;;  %s538_s18 = int_to_ptr.vmem [resolvable:$false] %s537_s18 }
  0x5c   : > { %230 = vst [vmem:[#allocation2] sm:$0xff] %v227_v7  ;;  %s539_s5 = scalar_lea.vmem %s538_s18, 256  ;;  %p540_p10 = scmp.lt.s32.totalorder %s817_s29, %s538_s18 }
  0x5d   : > { %p536_p4 = pneg %p535_p7  ;;  %p541_p12 = scmp.lt.s32.totalorder %s539_s5, %s533_s6 }
  0x5f   : > { %p542_p1 = por %p541_p12, %p540_p10 }
  0x61   : > { %p543_p2 = pnand %p542_p1, %p536_p4 }
  0x63   : > { %v234_v8 = vld [vmem:[#allocation2] sm:$0xf]  ;;  %v250_v9 = vld [vmem:[#allocation2 + $0x4] sm:$0xf] }
  0x64   : > { %v236_v10 = vsel %vm235_vm1, %v234_v8, 0.0  ;;  %v251_v11 = vsel %vm235_vm1, %v250_v9, 0.0 }
  0x65   : > { %237 = vadd.xlane.f32.xlu0 %v236_v10 }
  0x69   : > { %252 = vadd.xlane.f32.xlu0 %v251_v11 }
  0xf2   : > { %v238_v12 = vpop.xlane.xlu0 %237 }
  0xf3   : > { %v239_v13 = vrot.slane %v238_v12, 4 }
  0xf5   : > { %v240_v14 = vadd.f32 %v239_v13, %v238_v12 }
  0xf6   : > { %v253_v15 = vpop.xlane.xlu0 %252 }
  0xf7   : > { %v241_v16 = vrot.slane %v240_v14, 2  ;;  %v254_v17 = vrot.slane %v253_v15, 4 }
  0xf9   : > { %v255_v18 = vadd.f32 %v254_v17, %v253_v15  ;;  %v242_v19 = vadd.f32 %v241_v16, %v240_v14 }
  0xfb   : > { %v256_v20 = vrot.slane %v255_v18, 2  ;;  %v243_v21 = vrot.slane %v242_v19, 1 }
  0xfd   : > { %v257_v22 = vadd.f32 %v256_v20, %v255_v18  ;;  %v244_v23 = vadd.f32 %v243_v21, %v242_v19 }
  0xff   : > { %401 = vpush %v244_v23  ;;  %v258_v24 = vrot.slane %v257_v22, 1 }
 0x101   : > { %v259_v25 = vadd.f32 %v258_v24, %v257_v22 }
 0x103   : > { %403 = vpush %v259_v25 }
 0x130   : > { %s402_s21 = spop %401 }
 0x131   : > { %s248_s30 = smul.f32 0.0009765625, %s402_s21 }
 0x134   : > { %s404_s16 = spop %403 }
 0x135   : > { %s263_s19 = smul.f32 0.0009765625, %s404_s16 }
 0x137   : > { %s264_s27 = smul.f32 0.5, %s263_s19 }
 0x139   : > { %s265_s25 = sadd.f32 %s264_s27, %s248_s30 }
 0x13b   : > { %v266_v26 = vstv %s265_s25 }
 0x13c   : > { %267 = vst [vmem:[%s213_s28] sm:$0xff] %v266_v26 }
 0x13d   : > { %546 = shalt.err (!%p543_p2)
}
 0x13e   : > { %s547_s15 = scalar_lea.hbm %s815_s8, 128  ;;  %s551_s16 = scalar_lea.hbm %s866_s2, 256 }
 0x13f   : > { %p548_p9 = scmp.ne.s32.totalorder %s815_s8, %s547_s15  ;;  %p552_p6 = scmp.lt.u32.totalorder %s815_s8, %s866_s2 }
 0x140   : > { %p553_p13 = scmp.lt.u32.totalorder %s551_s16, %s547_s15  ;;  %p555_p0 = scmp.lt.u32.totalorder %s547_s15, %s815_s8 }
 0x141   : > { %p549_p11 = pnand %p548_p9, %p879_p5 }
 0x142   : > { %p554_p8 = por %p553_p13, %p552_p6 }
 0x143   : > { %p550_p3 = pneg %p549_p11 }
 0x144   : > { %p556_p7 = por %p555_p0, %p554_p8 }
 0x146   : > { %p557_p4 = pnand %p556_p7, %p550_p3 }
 0x148   : > { %560 = shalt.err (!%p557_p4)
}
 0x149   : > { %409 = dma.vmem_to_hbm [thread:$0]  (%p879_p5), %s817_s29, 128, %s815_s8, %s269_s4  }
 0x14a PF: > { %s294_s20 = sand.u32 1, %s599_s9   ;;  %p880_p10 = scmp.ne.s32.totalorder %s872_s24, 0 }
 0x14b   : > { %p881_p12 = scmp.ge.s32.totalorder %s619_s14, 2  ;;  %s295_s27 = scalar_lea.sflag [#allocation5], %s294_s20 }
 0x14d   : > { %p419_p1 = pnand %p881_p12, %p880_p10 }
 0x14f   : > { %594 = dma.done.wait (!%p419_p1), %s295_s27, 128  }
 0x150   : > { %596 = vsyncadd (!%p419_p1), %s295_s27, 4294967168  ;;  %s21_s14 = sadd.s32 1, %s619_s14   ;;  %s882_s9 = smov %s603_s10 }
 0x151   : > { %p18_p2 = scmp.ge.s32.totalorder %s21_s14, 4   ;;  %s883_s10 = smov %s607_s11 }
 0x152   : > { %s884_s11 = smov %s695_s23  ;;  %s885_s12 = smov %s615_s13 }
 0x153   : > { %s886_s13 = smov %s888_s17  ;;  %20 = sbr.rel (!%p18_p2) target bundleno = 8 (0x8), region = 94 }
 0x15a   :  { %300 = vsyncpa [#allocation4], 1 }
 0x15b   :  { %302 = vsyncpa [#allocation4 + $0x1], 1 }
 0x15c   :  { %303 = vsyncpa [#allocation7], 1 }
 0x15d   :  { %305 = vsyncpa [#allocation7 + $0x1], 1 }
 0x15e   :  { %306 = vsyncpa [#allocation5], 1 }
 0x15f   :  { %308 = vsyncpa [#allocation5 + $0x1], 1 }

</bundles_post_ra>
